<compile_context>
chip_gen: v5e
topology: v5e:2x2
jax: 0.10.0
libtpu: 0.0.40
codegen_flags: <defaults>
</compile_context>

<pallas_src>
import jax
import jax.numpy as jnp
from jax.experimental import pallas as pl
from jax.experimental.pallas import tpu as pltpu


def node_model_kernel(x_ref, feat_ref, row_ref, out_ref, acc_ref):
    i = pl.program_id(0)                       # node (output-row) tile
    e = pl.program_id(1)                       # edge (reduction) tile
    n_t = acc_ref.shape[0]
    e_t = row_ref.shape[1]
    f_aug = feat_ref.shape[1]                  # Fx + Fe + 1 (ones col = count)

    @pl.when(e == 0)
    def _init():
        acc_ref[...] = jnp.zeros_like(acc_ref)

    row = row_ref[...]                         # [1, E_t] i32 (dest node / edge)
    feat = feat_ref[...]                       # [E_t, Fx+Fe+1] f32

    # Scatter one-hot for this node tile: row_oh[n, e] = (row[e] == i*n_t + n).
    node_ids = jax.lax.broadcasted_iota(jnp.int32, (n_t, e_t), 0) + i * n_t
    row_oh = (node_ids == row).astype(jnp.float32)               # [N_t, E_t]

    # Single fused scatter-add (sums of x[col], edge_attr AND in-degree).
    acc_ref[...] += jax.lax.dot_general(
        row_oh, feat,
        dimension_numbers=(((1,), (0,)), ((), ())),
        preferred_element_type=jnp.float32,
        precision=jax.lax.Precision.HIGHEST)

    @pl.when(e == pl.num_programs(1) - 1)
    def _finalize():
        acc = acc_ref[...]
        cnt = acc[:, f_aug - 1:f_aug]                             # [N_t, 1]
        inv = pl.reciprocal(jnp.maximum(cnt, 1.0), approx=False)  # exact 1/x
        mean = acc[:, :f_aug - 1] * inv                           # [N_t, Fx+Fe]
        # One full-width store of the whole output tile.
        out_ref[...] = jnp.concatenate([x_ref[...], mean], axis=1)


def _round_up(a, b):
    return -(-a // b) * b


def node_model_forward(x, edge_index, edge_attr, *, node_tile=256,
                       edge_tile=1024):
    """out = cat([x, scatter_mean(cat([x[col], edge_attr], 1), row, N)], 1)."""
    assert node_tile % 8 == 0 and edge_tile % 128 == 0
    x = x.astype(jnp.float32)
    edge_attr = edge_attr.astype(jnp.float32)
    num_n, fx = x.shape
    num_e, fe = edge_attr.shape
    f_aug = fx + fe + 1
    fo = 2 * fx + fe

    n_t = node_tile if num_n >= node_tile else _round_up(num_n, 8)
    n_pad = _round_up(num_n, n_t)
    e_t = edge_tile if num_e >= edge_tile else _round_up(num_e, 128)
    e_pad = _round_up(num_e, e_t)

    row = edge_index[0].astype(jnp.int32)
    col = edge_index[1].astype(jnp.int32)

    # Pad node features with zero rows (sliced off at the end).
    x_p = jnp.zeros((n_pad, fx), jnp.float32).at[:num_n, :].set(x)

    # Hoisted gather: build [ x[col] | edge_attr | 1 ] once in the wrapper.
    feat = jnp.concatenate(
        [jnp.take(x, col, axis=0), edge_attr,
         jnp.ones((num_e, 1), jnp.float32)], axis=1)              # [E, f_aug]
    feat_p = jnp.zeros((e_pad, f_aug), jnp.float32).at[:num_e, :].set(feat)

    # Lane-major [1, E_pad] destination indices; padded edges get -1 so the
    # scatter one-hot is all-false for them.
    # TODO(synk): out-of-range row/col indices are silently dropped here,
    # whereas torch_scatter / torch indexing would raise.
    row_idx = jnp.full((1, e_pad), -1, jnp.int32).at[0, :num_e].set(row)

    grid = (n_pad // n_t, e_pad // e_t)
    ni = grid[0]

    flops = 2.0 * n_pad * e_pad * f_aug                 # ni * (n_t*e_pad*f_aug)
    bytes_accessed = 4.0 * (ni * e_pad * f_aug          # feat re-read per node tile
                            + ni * e_pad                # row indices
                            + n_pad * fx                # x tiles
                            + n_pad * fo)               # output

    out = pl.pallas_call(
        node_model_kernel,
        out_shape=jax.ShapeDtypeStruct((n_pad, fo), jnp.float32),
        grid=grid,
        in_specs=[
            pl.BlockSpec((n_t, fx), lambda i, e: (i, 0)),        # x tile
            pl.BlockSpec((e_t, f_aug), lambda i, e: (e, 0)),     # [x[col]|ea|1]
            pl.BlockSpec((1, e_t), lambda i, e: (0, e)),         # row (lane-major)
        ],
        # Output block index constant along the edge axis -> resident tile.
        out_specs=pl.BlockSpec((n_t, fo), lambda i, e: (i, 0)),
        scratch_shapes=[
            pltpu.VMEM((n_t, f_aug), jnp.float32),   # sum of [x[col]|ea] | count
        ],
        compiler_params=pltpu.CompilerParams(
            dimension_semantics=("parallel", "arbitrary"),
            vmem_limit_bytes=32 * 1024 * 1024,
        ),
        cost_estimate=pl.CostEstimate(
            flops=int(flops),
            transcendentals=0,
            bytes_accessed=int(bytes_accessed)),
    )(x_p, feat_p, row_idx)

    return out[:num_n, :]


def _reference(x, edge_index, edge_attr):
    # Pure-JAX reference mirroring torch_scatter's scatter_mean.
    row, col = edge_index[0], edge_index[1]
    n = x.shape[0]
    edge_feat = jnp.concatenate([x[col], edge_attr], axis=1)
    summed = jax.ops.segment_sum(edge_feat, row, num_segments=n)
    count = jax.ops.segment_sum(jnp.ones((edge_feat.shape[0],)), row,
                                num_segments=n)
    mean = summed / jnp.maximum(count, 1.0)[:, None]
    return jnp.concatenate([x, mean], axis=1)


if __name__ == "__main__":
    # Small GraphNets-style shapes: 40 nodes, 300 directed edges,
    # n_node_features=4, edge feature width (hiddens)=8.
    N, E, Fx, Fe = 40, 300, 4, 8

    key = jax.random.PRNGKey(0)
    kx, ke, kr, kc = jax.random.split(key, 4)
    x = jax.random.normal(kx, (N, Fx), dtype=jnp.float32)
    edge_attr = jax.random.normal(ke, (E, Fe), dtype=jnp.float32)
    row = jax.random.randint(kr, (E,), 0, N, dtype=jnp.int32)
    col = jax.random.randint(kc, (E,), 0, N, dtype=jnp.int32)
    edge_index = jnp.stack([row, col], axis=0)        # [2, E]

    # Small tiles so the demo exercises both grid axes (3 node x 3 edge tiles)
    # and the edge-axis accumulator / padding paths.
    out = node_model_forward(x, edge_index, edge_attr,
                             node_tile=16, edge_tile=128)
    out = jax.block_until_ready(out)

    ref = _reference(x, edge_index, edge_attr)
    assert out.shape == (N, 2 * Fx + Fe), out.shape
    assert jnp.allclose(out, ref, atol=1e-4, rtol=1e-4), float(
        jnp.max(jnp.abs(out - ref)))

    print("KERNEL_OK")
</pallas_src>

<mosaic_0001>
module attributes {stable_mosaic.version = 11 : i64} {
  func.func @node_model_kernel(%arg0: i32, %arg1: i32, %arg2: memref<16x4xf32, #tpu.memory_space<vmem>>, %arg3: memref<128x13xf32, #tpu.memory_space<vmem>>, %arg4: memref<1x128xi32, #tpu.memory_space<vmem>>, %arg5: memref<16x16xf32, #tpu.memory_space<vmem>>, %arg6: memref<16x13xf32, #tpu.memory_space<vmem>>) attributes {dimension_semantics = [#tpu.dimension_semantics<parallel>, #tpu.dimension_semantics<arbitrary>], iteration_bounds = array<i64: 3, 3>, scalar_prefetch = 0 : i64, scratch_operands = 1 : i64, tpu.core_type = #tpu.core_type<tc>, window_params = [{transform_indices = @transform_0, window_bounds = array<i64: 16, 4>}, {transform_indices = @transform_1, window_bounds = array<i64: 128, 13>}, {transform_indices = @transform_2, window_bounds = array<i64: 1, 128>}, {transform_indices = @transform_3, window_bounds = array<i64: 16, 16>}]} {
    %c0_i32 = arith.constant 0 : i32
    %0 = arith.cmpi eq, %arg1, %c0_i32 : i32
    %1 = arith.extui %0 : i1 to i32
    %c0_i32_0 = arith.constant 0 : i32
    %2 = arith.cmpi ne, %1, %c0_i32_0 : i32
    scf.if %2 {
      %cst_9 = arith.constant 0.000000e+00 : f32
      %20 = vector.broadcast %cst_9 : f32 to vector<16x13xf32>
      %c0_10 = arith.constant 0 : index
      %c0_11 = arith.constant 0 : index
      %21 = vector.load %arg6[%c0_10, %c0_11] : memref<16x13xf32, #tpu.memory_space<vmem>>, vector<16x13xf32>
      tpu.vector_store %arg6[%c0_10, %c0_11], %20 {strides = array<i32>} : memref<16x13xf32, #tpu.memory_space<vmem>>, vector<16x13xf32>,
    } else {
    }
    %c0 = arith.constant 0 : index
    %c0_1 = arith.constant 0 : index
    %3 = vector.load %arg4[%c0, %c0_1] : memref<1x128xi32, #tpu.memory_space<vmem>>, vector<1x128xi32>
    %c0_2 = arith.constant 0 : index
    %c0_3 = arith.constant 0 : index
    %4 = vector.load %arg3[%c0_2, %c0_3] : memref<128x13xf32, #tpu.memory_space<vmem>>, vector<128x13xf32>
    %5 = tpu.iota {dimensions = array<i32: 0>} : vector<16x128xi32>
    %c16_i32 = arith.constant 16 : i32
    %6 = arith.muli %arg0, %c16_i32 : i32
    %7 = vector.broadcast %6 : i32 to vector<16x128xi32>
    %8 = arith.addi %5, %7 : vector<16x128xi32>
    %9 = vector.broadcast %3 : vector<1x128xi32> to vector<16x128xi32>
    %10 = arith.cmpi eq, %8, %9 : vector<16x128xi32>
    %11 = arith.extui %10 : vector<16x128xi1> to vector<16x128xi32>
    %12 = arith.sitofp %11 : vector<16x128xi32> to vector<16x128xf32>
    %c0_4 = arith.constant 0 : index
    %c0_5 = arith.constant 0 : index
    %13 = vector.load %arg6[%c0_4, %c0_5] : memref<16x13xf32, #tpu.memory_space<vmem>>, vector<16x13xf32>
    %cst = arith.constant dense<0.000000e+00> : vector<16x13xf32>
    %14 = tpu.matmul %12, %4, %cst {dimension_numbers = #tpu.dot_dimension_numbers<[1], [0], [0], [1], [0, 0, 1, 1], [], []>, precision = #tpu.contract_precision<fp32>} : vector<16x128xf32>, vector<128x13xf32>, vector<16x13xf32> -> vector<16x13xf32>
    %15 = arith.addf %13, %14 : vector<16x13xf32>
    %c0_6 = arith.constant 0 : index
    %c0_7 = arith.constant 0 : index
    %16 = vector.load %arg6[%c0_6, %c0_7] : memref<16x13xf32, #tpu.memory_space<vmem>>, vector<16x13xf32>
    tpu.vector_store %arg6[%c0_6, %c0_7], %15 {strides = array<i32>} : memref<16x13xf32, #tpu.memory_space<vmem>>, vector<16x13xf32>,
    %c2_i32 = arith.constant 2 : i32
    %17 = arith.cmpi eq, %arg1, %c2_i32 : i32
    %18 = arith.extui %17 : i1 to i32
    %c0_i32_8 = arith.constant 0 : i32
    %19 = arith.cmpi ne, %18, %c0_i32_8 : i32
    scf.if %19 {
      %c0_9 = arith.constant 0 : index
      %c0_10 = arith.constant 0 : index
      %20 = vector.load %arg6[%c0_9, %c0_10] : memref<16x13xf32, #tpu.memory_space<vmem>>, vector<16x13xf32>
      %21 = vector.extract_strided_slice %20 {offsets = [0, 12], sizes = [16, 1], strides = [1, 1]} : vector<16x13xf32> to vector<16x1xf32>
      %cst_11 = arith.constant 1.000000e+00 : f32
      %22 = vector.broadcast %cst_11 : f32 to vector<16x1xf32>
      %23 = arith.maximumf %21, %22 : vector<16x1xf32>
      %24 = tpu.reciprocal %23 : vector<16x1xf32> -> vector<16x1xf32>
      %25 = vector.extract_strided_slice %20 {offsets = [0, 0], sizes = [16, 12], strides = [1, 1]} : vector<16x13xf32> to vector<16x12xf32>
      %26 = vector.broadcast %24 : vector<16x1xf32> to vector<16x12xf32>
      %27 = arith.mulf %25, %26 : vector<16x12xf32>
      %c0_12 = arith.constant 0 : index
      %c0_13 = arith.constant 0 : index
      %28 = vector.load %arg2[%c0_12, %c0_13] : memref<16x4xf32, #tpu.memory_space<vmem>>, vector<16x4xf32>
      %29 = tpu.concatenate %28, %27 in 1 : vector<16x4xf32>, vector<16x12xf32> -> vector<16x16xf32>
      %c0_14 = arith.constant 0 : index
      %c0_15 = arith.constant 0 : index
      %30 = vector.load %arg5[%c0_14, %c0_15] : memref<16x16xf32, #tpu.memory_space<vmem>>, vector<16x16xf32>
      tpu.vector_store %arg5[%c0_14, %c0_15], %29 {strides = array<i32>} : memref<16x16xf32, #tpu.memory_space<vmem>>, vector<16x16xf32>,
    } else {
    }
    return
  }
  func.func @transform_0(%arg0: i32, %arg1: i32) -> (i32, i32) {
    %c0_i32 = arith.constant 0 : i32
    %c0_i32_0 = arith.constant 0 : i32
    return %arg0, %c0_i32 : i32, i32
  }
  func.func @transform_1(%arg0: i32, %arg1: i32) -> (i32, i32) {
    %c0_i32 = arith.constant 0 : i32
    %c0_i32_0 = arith.constant 0 : i32
    return %arg1, %c0_i32 : i32, i32
  }
  func.func @transform_2(%arg0: i32, %arg1: i32) -> (i32, i32) {
    %c0_i32 = arith.constant 0 : i32
    %c0_i32_0 = arith.constant 0 : i32
    return %c0_i32, %arg1 : i32, i32
  }
  func.func @transform_3(%arg0: i32, %arg1: i32) -> (i32, i32) {
    %c0_i32 = arith.constant 0 : i32
    %c0_i32_0 = arith.constant 0 : i32
    return %arg0, %c0_i32 : i32, i32
  }
}

</mosaic_0001>

<bundles_post_ra>
// kernel: tpu_custom_call.1
= control target key start
LH: loop header
LB: loop body
LE: loop exit
PB: predicated region body
PF: predicated region fallthrough
CT: control target
= control target key end

     0   :  { %s964_s12 = smov 0   ;;  %s966_s13 = smov 0   ;;  %s1297_s0 = inlined_call_operand.vmem [shape: f32[48,4], index: 0, kind: input, shape index: {}]   ;;  %s1298_s1 = inlined_call_operand.vmem [shape: f32[384,13], index: 1, kind: input, shape index: {}]   ;;  %s1299_s2 = inlined_call_operand.vmem [shape: s32[1,384], index: 2, kind: input, shape index: {}]   ;;  %s1300_s3 = inlined_call_operand.vmem [shape: f32[48,16], index: 3, kind: output, shape index: {}]  }
   0x1   :  { %s968_s14 = smov 0   ;;  %s970_s15 = smov 0  }
   0x2   :  { %s972_s16 = smov 0  }
   0x3 LB: > { %s22_s17 = sadd.s32 1, %s929_s14  ;;  %s25_s18 = sadd.s32 1, %s933_s15  ;;  %s937_s16 = sphi %s972_s16, %s13_s16   ;;  %s933_s15 = sphi %s970_s15, %s1304_s15   ;;  %s929_s14 = sphi %s968_s14, %s1303_s14   ;;  %s925_s13 = sphi %s966_s13, %s1302_s13   ;;  %s921_s12 = sphi %s964_s12, %s1301_s12  }
   0x4   : > { %p23_p0 = scmp.ge.s32.totalorder %s22_s17, 3  ;;  %p796_p1 = scmp.ge.s32.totalorder %s937_s16, 1 }
   0x5   : > { %p169_p2 = scmp.lt.s32.totalorder %s937_s16, 10 }
   0x6   : > { %s1306_s17 = smov (%p23_p0, %s22_s17), 0  ;;  %s1308_s18 = smov (!%p23_p0, %s25_s18), %s933_s15 }
   0x7   : > { %p170_p3 = pnand %p796_p1, %p169_p2  ;;  %p27_p4 = scmp.ge.s32.totalorder %s1308_s18, 3 }
   0x8   : > { %s797_s19 = sshll.u32 (!%p170_p3), %s925_s13, 1  ;;  %s799_s20 = sshll.u32 (!%p170_p3), %s921_s12, 4 }
   0x9   : > { %s1310_s18 = smov (%p27_p4, %s1308_s18), 0  ;;  %173 = sbr.rel (%p170_p3) target bundleno = 502 (0x1f6), region = 32 }
   0xa   : > { %p202_p5 = scmp.lt.s32.totalorder (!%p170_p3), %s797_s19, 5  ;;  %p208_p6 = scmp.lt.s32.totalorder (!%p170_p3), %s799_s20, 47 }
   0xb   : > { %p213_p7 = scmp.lt.s32.totalorder (!%p170_p3), %s921_s12, 2  ;;  %p803_p8 = scmp.ne.s32.totalorder (!%p170_p3), %s921_s12, 0 }
   0xe   : > { %s1312_s19 = smov (!%p202_p5, %s797_s19), 5  ;;  %s1314_s20 = smov (!%p208_p6, %s799_s20), 47 }
   0xf   : > { %s798_s21 = sshll.u32 %s1312_s19, 3  ;;  %s800_s25 = sshll.u32 %s1314_s20, 3 }
  0x10   : > { %s1004_s24 = scalar_lea.vmem %s1297_s0, %s798_s21  ;;  %s1009_s28 = scalar_lea.vmem %s1298_s1, %s800_s25 }
  0x11   : > { %s1014_s4 = scalar_lea.vmem %s1300_s3, %s798_s21  ;;  %225 = sbr.rel (%p803_p8) target bundleno = 25 (0x19), region = 36 }
  0x12   : > { %s1017_s5 = scalar_select %p213_p7, %s921_s12, 2 }
  0x14   : > { %s215_s8 = scalar_lea.vmem %s1299_s2, %s1017_s5 }
  0x16   : > { %vm226_vm0 = vcmask 105472   ;;  %v939_v0 = vmov 0.0  }
  0x17   : > { %227 = vst.msk [vmem:[#allocation2] sm:$0xff] %vm226_vm0, %v939_v0 }
  0x18   : > { %228 = vst.msk [vmem:[#allocation2 + $0x8] sm:$0xff] %vm226_vm0, %v939_v0 }
  0x19 PF: > { %v245_v1 = vld [vmem:[%s1009_s28 + $0x78] sm:$0xff]  ;;  %v244_v2 = vld [vmem:[%s1009_s28 + $0x70] sm:$0xff]  ;;  %v243_v3 = vld [vmem:[%s1009_s28 + $0x68] sm:$0xff]  ;;  %v246_v63 = vlaneseq  ;;  %s804_s9 = sshll.u32 %s925_s13, 4  ;;  %vm636_vm3 = vcmask 105472   ;;  %p813_p9 = scmp.ne.s32.totalorder %s921_s12, 2 }
  0x1a   : > { %v1027_v4 = vand.u32 4294901760, %v245_v1  ;;  %v1029_v5 = vand.u32 4294901760, %v244_v2  ;;  %v1031_v6 = vand.u32 4294901760, %v243_v3  ;;  %v242_v7 = vld [vmem:[%s1009_s28 + $0x60] sm:$0xff]  ;;  %v241_v8 = vld [vmem:[%s1009_s28 + $0x58] sm:$0xff]  ;;  %v240_v9 = vld [vmem:[%s1009_s28 + $0x50] sm:$0xff] }
  0x1b   : > { %v1036_v10 = vand.u32 4294901760, %v242_v7  ;;  %v1038_v11 = vand.u32 4294901760, %v241_v8  ;;  %v1040_v12 = vand.u32 4294901760, %v240_v9  ;;  %v239_v13 = vld [vmem:[%s1009_s28 + $0x48] sm:$0xff]  ;;  %v238_v14 = vld [vmem:[%s1009_s28 + $0x40] sm:$0xff]  ;;  %v237_v19 = vld [vmem:[%s1009_s28 + $0x38] sm:$0xff] }
  0x1c   : > { %263 = vmatpush.msra.mxu0 %v1027_v4  ;;  %v312_v15 = vsub.f32 %v245_v1, %v1027_v4  ;;  %v318_v16 = vsub.f32 %v244_v2, %v1029_v5  ;;  %476 = vmatpush.msra.mxu3 %v1027_v4  ;;  %v324_v17 = vsub.f32 %v243_v3, %v1031_v6  ;;  %v1049_v18 = vand.u32 4294901760, %v239_v13  ;;  %v236_v27 = vld [vmem:[%s1009_s28 + $0x30] sm:$0xff]  ;;  %v235_v37 = vld [vmem:[%s1009_s28 + $0x28] sm:$0xff]  ;;  %v234_v43 = vld [vmem:[%s1009_s28 + $0x20] sm:$0xff]  ;;  %s943_s12 = smov (!%p813_p9), 4  }
  0x1d   : > { %v330_v20 = vsub.f32 %v242_v7, %v1036_v10  ;;  %v336_v21 = vsub.f32 %v241_v8, %v1038_v11  ;;  %v1054_v22 = vand.u32 4294901760, %v238_v14  ;;  %v342_v26 = vsub.f32 %v240_v9, %v1040_v12  ;;  %v233_v50 = vld [vmem:[%s1009_s28 + $0x18] sm:$0xff]  ;;  %v232_v55 = vld [vmem:[%s1009_s28 + $0x10] sm:$0xff]  ;;  %v231_v62 = vld [vmem:[%s1009_s28 + $0x8] sm:$0xff] }
  0x1e   : > { %265 = vmatpush.msra.mxu0 %v1029_v5  ;;  %418 = vmatpush.msra.mxu2 %v312_v15  ;;  %v1057_v23 = vand.u32 4294901760, %v312_v15  ;;  %v1059_v24 = vand.u32 4294901760, %v318_v16  ;;  %v1061_v25 = vand.u32 4294901760, %v324_v17  ;;  %v348_v29 = vsub.f32 %v239_v13, %v1049_v18  ;;  %v230_v7 = vld [vmem:[%s1009_s28] sm:$0xff] }
  0x1f   : > { %478 = vmatpush.msra.mxu3 %v1029_v5  ;;  %v1066_v28 = vand.u32 4294901760, %v330_v20  ;;  %v1069_v30 = vand.u32 4294901760, %v237_v19  ;;  %v1075_v34 = vand.u32 4294901760, %v336_v21  ;;  %v354_v35 = vsub.f32 %v238_v14, %v1054_v22 }
  0x20   : > { %267 = vmatpush.msra.mxu0 %v1031_v6  ;;  %421 = vmatpush.msra.mxu2 %v318_v16  ;;  %v314_v31 = vsub.f32 %v312_v15, %v1057_v23  ;;  %v320_v32 = vsub.f32 %v318_v16, %v1059_v24  ;;  %v326_v33 = vsub.f32 %v324_v17, %v1061_v25  ;;  %v1079_v36 = vand.u32 4294901760, %v236_v27 }
  0x21   : > { %480 = vmatpush.msra.mxu3 %v1031_v6  ;;  %v332_v40 = vsub.f32 %v330_v20, %v1066_v28  ;;  %v1084_v41 = vand.u32 4294901760, %v342_v26  ;;  %v1087_v42 = vand.u32 4294901760, %v348_v29  ;;  %v338_v45 = vsub.f32 %v336_v21, %v1075_v34 }
  0x22   : > { %269 = vmatpush.msra.mxu0 %v1036_v10  ;;  %424 = vmatpush.msra.mxu2 %v324_v17  ;;  %v315_v38 = vand.u32 4294901760, %v314_v31  ;;  %v321_v39 = vand.u32 4294901760, %v320_v32  ;;  %v327_v44 = vand.u32 4294901760, %v326_v33  ;;  %v360_v46 = vsub.f32 %v237_v19, %v1069_v30 }
  0x23   : > { %482 = vmatpush.msra.mxu3 %v1036_v10  ;;  %v1093_v47 = vand.u32 4294901760, %v235_v37  ;;  %v1097_v48 = vsub.f32 %v236_v27, %v1079_v36  ;;  %v1099_v49 = vand.u32 4294901760, %v354_v35  ;;  %v333_v51 = vand.u32 4294901760, %v332_v40 }
  0x24   : > { %271 = vmatpush.msra.mxu0 %v1038_v11  ;;  %316 = vmatpush.msra.mxu1 %v315_v38  ;;  %v344_v52 = vsub.f32 %v342_v26, %v1084_v41  ;;  %v1104_v53 = vand.u32 4294901760, %v234_v43  ;;  %v350_v54 = vsub.f32 %v348_v29, %v1087_v42  ;;  %v339_v56 = vand.u32 4294901760, %v338_v45 }
  0x25   : > { %427 = vmatpush.msra.mxu2 %v330_v20  ;;  %484 = vmatpush.msra.mxu3 %v1038_v11  ;;  %v372_v57 = vsub.f32 %v235_v37, %v1093_v47  ;;  %v1111_v58 = vand.u32 4294901760, %v233_v50  ;;  %v1113_v59 = vand.u32 4294901760, %v360_v46  ;;  %v356_v60 = vsub.f32 %v354_v35, %v1099_v49 }
  0x26   : > { %273 = vmatpush.msra.mxu0 %v1040_v12  ;;  %322 = vmatpush.msra.mxu1 %v321_v39  ;;  %v1118_v61 = vand.u32 4294901760, %v1097_v48  ;;  %v345_v0 = vand.u32 4294901760, %v344_v52  ;;  %v378_v1 = vsub.f32 %v234_v43, %v1104_v53  ;;  %v1123_v2 = vand.u32 4294901760, %v232_v55 }
  0x27   : > { %430 = vmatpush.msra.mxu2 %v336_v21  ;;  %486 = vmatpush.msra.mxu3 %v1040_v12  ;;  %v351_v3 = vand.u32 4294901760, %v350_v54  ;;  %v362_v8 = vsub.f32 %v360_v46, %v1113_v59  ;;  %v384_v9 = vsub.f32 %v233_v50, %v1111_v58  ;;  %v1131_v13 = vand.u32 4294901760, %v231_v62 }
  0x28   : > { %275 = vmatpush.msra.mxu0 %v1049_v18  ;;  %328 = vmatpush.msra.mxu1 %v327_v44  ;;  %v1133_v14 = vand.u32 4294901760, %v372_v57  ;;  %v357_v15 = vand.u32 4294901760, %v356_v60  ;;  %v368_v16 = vsub.f32 %v1097_v48, %v1118_v61  ;;  %v247_v17 = vshrl.u32 %v246_v63, 7 }
  0x29   : > { %433 = vmatpush.msra.mxu2 %v342_v26  ;;  %488 = vmatpush.msra.mxu3 %v1049_v18  ;;  %v390_v19 = vsub.f32 %v232_v55, %v1123_v2  ;;  %v1140_v20 = vand.u32 4294901760, %v230_v7  ;;  %v1142_v21 = vand.u32 4294901760, %v378_v1  ;;  %v250_v26 = vstv %s804_s9 }
  0x2a   : > { %277 = vmatpush.msra.mxu0 %v1054_v22  ;;  %334 = vmatpush.msra.mxu1 %v333_v51  ;;  %v363_v27 = vand.u32 4294901760, %v362_v8  ;;  %v396_v31 = vsub.f32 %v231_v62, %v1131_v13  ;;  %v1148_v32 = vand.u32 4294901760, %v384_v9  ;;  %v1152_v33 = vadd.s32 %v250_v26, %v247_v17  ;;  %v260_v8 = vld [vmem:[#allocation2] sm:$0xff] }
  0x2b   : > { %436 = vmatpush.msra.mxu2 %v348_v29  ;;  %490 = vmatpush.msra.mxu3 %v1054_v22  ;;  %v374_v29 = vsub.f32 %v372_v57, %v1133_v14  ;;  %v369_v37 = vand.u32 4294901760, %v368_v16  ;;  %v380_v38 = vsub.f32 %v378_v1, %v1142_v21  ;;  %v402_v39 = vsub.f32 %v230_v7, %v1140_v20 }
  0x2c   : > { %279 = vmatpush.msra.mxu0 %v1069_v30  ;;  %340 = vmatpush.msra.mxu1 %v339_v56  ;;  %v1164_v40 = vand.u32 4294901760, %v390_v19  ;;  %v386_v44 = vsub.f32 %v384_v9, %v1148_v32  ;;  %v1169_v45 = vand.u32 4294901760, %v396_v31  ;;  %v248_v51 = vadd.s32 8, %v247_v17 }
  0x2d   : > { %439 = vmatpush.msra.mxu2 %v354_v35  ;;  %492 = vmatpush.msra.mxu3 %v1069_v30  ;;  %v1159_v35 = vld [vmem:[%s215_s8] ss:$0 sm:$0xff]  ;;  %v375_v43 = vand.u32 4294901760, %v374_v29  ;;  %v1176_v50 = vand.u32 4294901760, %v402_v39  ;;  %v940_v55 = vmov 0.0  }
  0x2e   : > { %281 = vmatpush.msra.mxu0 %v1079_v36  ;;  %346 = vmatpush.msra.mxu1 %v345_v0  ;;  %vm254_vm1 = vcmp.eq.s32.totalorder %v1152_v33, %v1159_v35  ;;  %v387_v52 = vand.u32 4294901760, %v386_v44  ;;  %v398_v54 = vsub.f32 %v396_v31, %v1169_v45  ;;  %v1188_v63 = vadd.s32 %v250_v26, %v248_v51 }
  0x2f   : > { %442 = vmatpush.msra.mxu2 %v360_v46  ;;  %494 = vmatpush.msra.mxu3 %v1079_v36  ;;  %v381_v46 = vand.u32 4294901760, %v380_v38  ;;  %v805_v56 = vsel %vm254_vm1, 1.0, %v940_v55  ;;  %v404_v60 = vsub.f32 %v402_v39, %v1176_v50 }
  0x30   : > { %283 = vmatpush.msra.mxu0 %v1093_v47  ;;  %352 = vmatpush.msra.mxu1 %v351_v3  ;;  %v295_v62 = vsub.f32 %v805_v56, %v805_v56  ;;  %v399_v0 = vand.u32 4294901760, %v398_v54  ;;  %vm255_vm2 = vcmp.eq.s32.totalorder %v1188_v63, %v1159_v35 }
  0x31   : > { %445 = vmatpush.msra.mxu2 %v1097_v48  ;;  %496 = vmatpush.msra.mxu3 %v1093_v47  ;;  %v392_v48 = vsub.f32 %v390_v19, %v1164_v40 }
  0x32   : > { %285 = vmatpush.msra.mxu0 %v1104_v53  ;;  %358 = vmatpush.msra.mxu1 %v357_v15  ;;  %v296_v3 = vand.u32 4294901760, %v295_v62  ;;  %v261_v15 = vld [vmem:[#allocation2 + $0x8] sm:$0xff] }
  0x33   : > { %448 = vmatpush.msra.mxu2 %v372_v57  ;;  %498 = vmatpush.msra.mxu3 %v1104_v53  ;;  %v393_v57 = vand.u32 4294901760, %v392_v48 }
  0x34   : > { %287 = vmatpush.msra.mxu0 %v1111_v58  ;;  %364 = vmatpush.msra.mxu1 %v363_v27  ;;  %v297_v7 = vsub.f32 %v295_v62, %v296_v3 }
  0x35   : > { %451 = vmatpush.msra.mxu2 %v378_v1  ;;  %500 = vmatpush.msra.mxu3 %v1111_v58  ;;  %v405_v1 = vand.u32 4294901760, %v404_v60 }
  0x36   : > { %289 = vmatpush.msra.mxu0 %v1123_v2  ;;  %370 = vmatpush.msra.mxu1 %v369_v37 }
  0x37   : > { %454 = vmatpush.msra.mxu2 %v384_v9  ;;  %502 = vmatpush.msra.mxu3 %v1123_v2 }
  0x38   : > { %291 = vmatpush.msra.mxu0 %v1131_v13  ;;  %376 = vmatpush.msra.mxu1 %v375_v43 }
  0x39   : > { %457 = vmatpush.msra.mxu2 %v390_v19  ;;  %504 = vmatpush.msra.mxu3 %v1131_v13 }
  0x3a   : > { %293 = vmatpush.msra.mxu0 %v1140_v20  ;;  %382 = vmatpush.msra.mxu1 %v381_v46 }
  0x3b   : > { %460 = vmatpush.msra.mxu2 %v396_v31  ;;  %506 = vmatpush.msra.mxu3 %v1140_v20 }
  0x3c   : > { %523 = vmatpush.msrb.mxu0 %v1057_v23  ;;  %388 = vmatpush.msra.mxu1 %v387_v52 }
  0x3d   : > { %463 = vmatpush.msra.mxu2 %v402_v39  ;;  %832 = vmatpush.msrb.mxu3 %v1027_v4 }
  0x3e   : > { %527 = vmatpush.msrb.mxu0 %v1059_v24  ;;  %394 = vmatpush.msra.mxu1 %v393_v57 }
  0x3f   : > { %816 = vmatpush.msrb.mxu2 %v1057_v23  ;;  %833 = vmatpush.msrb.mxu3 %v1029_v5  ;;  %v806_v23 = vsel %vm255_vm2, 1.0, %v940_v55 }
  0x40   : > { %531 = vmatpush.msrb.mxu0 %v1061_v25  ;;  %400 = vmatpush.msra.mxu1 %v399_v0 }
  0x41   : > { %817 = vmatpush.msrb.mxu2 %v1059_v24  ;;  %834 = vmatpush.msrb.mxu3 %v1031_v6  ;;  %v303_v24 = vsub.f32 %v806_v23, %v806_v23 }
  0x42   : > { %535 = vmatpush.msrb.mxu0 %v1066_v28  ;;  %406 = vmatpush.msra.mxu1 %v405_v1 }
  0x43   : > { %818 = vmatpush.msrb.mxu2 %v1061_v25  ;;  %835 = vmatpush.msrb.mxu3 %v1036_v10  ;;  %v298_v25 = vand.u32 4294901760, %v297_v7 }
  0x44   : > { %539 = vmatpush.msrb.mxu0 %v1075_v34  ;;  %594 = vmatpush.msrb.mxu1 %v1027_v4  ;;  %v304_v4 = vand.u32 4294901760, %v303_v24 }
  0x45   : > { %819 = vmatpush.msrb.mxu2 %v1066_v28  ;;  %836 = vmatpush.msrb.mxu3 %v1038_v11 }
  0x46   : > { %543 = vmatpush.msrb.mxu0 %v1084_v41  ;;  %596 = vmatpush.msrb.mxu1 %v1029_v5  ;;  %v305_v5 = vsub.f32 %v303_v24, %v304_v4 }
  0x47   : > { %820 = vmatpush.msrb.mxu2 %v1075_v34  ;;  %837 = vmatpush.msrb.mxu3 %v1040_v12 }
  0x48   : > { %547 = vmatpush.msrb.mxu0 %v1087_v42  ;;  %598 = vmatpush.msrb.mxu1 %v1031_v6  ;;  %v306_v6 = vand.u32 4294901760, %v305_v5 }
  0x49   : > { %821 = vmatpush.msrb.mxu2 %v1084_v41  ;;  %299 = vmatmul.f32.vlgmr.msra.gmra.mxu0 %v298_v25 }
  0x4a   : > { %551 = vmatpush.msrb.mxu0 %v1099_v49  ;;  %600 = vmatpush.msrb.mxu1 %v1036_v10  ;;  %v941_v10 = vmov 1.0  }
  0x4b   : > { %822 = vmatpush.msrb.mxu2 %v1087_v42  ;;  %838 = vmatpush.msrb.mxu3 %v1049_v18 }
  0x4c   : > { %602 = vmatpush.msrb.mxu1 %v1038_v11  ;;  %555 = vmatpush.msrb.mxu0 %v1113_v59 }
  0x4d   : > { %823 = vmatpush.msrb.mxu2 %v1099_v49  ;;  %839 = vmatpush.msrb.mxu3 %v1054_v22 }
  0x4e   : > { %466 = vmatmul.f32.vlgmr.msra.gmra.mxu2 %v295_v62  ;;  %559 = vmatpush.msrb.mxu0 %v1118_v61 }
  0x4f   : > { %824 = vmatpush.msrb.mxu2 %v1113_v59  ;;  %604 = vmatpush.msrb.mxu1 %v1040_v12 }
  0x50   : > { %510 = vmatmul.f32.vlgmr.msra.gmra.mxu3 %v296_v3  ;;  %563 = vmatpush.msrb.mxu0 %v1133_v14 }
  0x51   : > { %825 = vmatpush.msrb.mxu2 %v1118_v61  ;;  %606 = vmatpush.msrb.mxu1 %v1049_v18 }
  0x52   : > { %840 = vmatpush.msrb.mxu3 %v1069_v30  ;;  %807 = vmatmul.msk.f32.vlgmr.msra.gmra.mxu1 %vm254_vm1, %v941_v10 }
  0x53   : > { %826 = vmatpush.msrb.mxu2 %v1133_v14  ;;  %567 = vmatpush.msrb.mxu0 %v1142_v21 }
  0x54   : > { %608 = vmatpush.msrb.mxu1 %v1054_v22  ;;  %841 = vmatpush.msrb.mxu3 %v1079_v36 }
  0x55   : > { %307 = vmatmul.f32.gmra.mxu0 %v306_v6  ;;  %827 = vmatpush.msrb.mxu2 %v1142_v21 }
  0x56   : > { %571 = vmatpush.msrb.mxu0 %v1148_v32  ;;  %610 = vmatpush.msrb.mxu1 %v1069_v30 }
  0x57   : > { %842 = vmatpush.msrb.mxu3 %v1093_v47  ;;  %471 = vmatmul.f32.gmra.mxu2 %v303_v24 }
  0x58   : > { %828 = vmatpush.msrb.mxu2 %v1148_v32  ;;  %575 = vmatpush.msrb.mxu0 %v1164_v40 }
  0x59   : > { %612 = vmatpush.msrb.mxu1 %v1079_v36  ;;  %843 = vmatpush.msrb.mxu3 %v1104_v53 }
  0x5a   : > { %516 = vmatmul.f32.gmra.mxu3 %v304_v4  ;;  %829 = vmatpush.msrb.mxu2 %v1164_v40 }
  0x5b   : > { %579 = vmatpush.msrb.mxu0 %v1169_v45  ;;  %614 = vmatpush.msrb.mxu1 %v1093_v47 }
  0x5c   : > { %844 = vmatpush.msrb.mxu3 %v1111_v58  ;;  %808 = vmatmul.msk.f32.gmra.mxu1 %vm255_vm2, %v941_v10 }
  0x5d   : > { %830 = vmatpush.msrb.mxu2 %v1169_v45  ;;  %583 = vmatpush.msrb.mxu0 %v1176_v50 }
  0x5e   : > { %616 = vmatpush.msrb.mxu1 %v1104_v53  ;;  %845 = vmatpush.msrb.mxu3 %v1123_v2 }
  0x5f   : > { %809 = vmatmul.msk.f32.vlgmr.msrb.gmra.mxu0 %vm254_vm1, %v941_v10  ;;  %831 = vmatpush.msrb.mxu2 %v1176_v50 }
  0x60   : > { %618 = vmatpush.msrb.mxu1 %v1111_v58  ;;  %846 = vmatpush.msrb.mxu3 %v1131_v13 }
  0x61   : > { %810 = vmatmul.msk.f32.vlgmr.msrb.gmra.mxu2 %vm255_vm2, %v941_v10 }
  0x62   : > { %620 = vmatpush.msrb.mxu1 %v1123_v2  ;;  %847 = vmatpush.msrb.mxu3 %v1140_v20 }
  0x63   : > { %812 = vmatmul.msk.f32.vlgmr.msrb.gmra.mxu3 %vm255_vm2, %v941_v10 }
  0x64   : > { %622 = vmatpush.msrb.mxu1 %v1131_v13 }
  0x66   : > { %624 = vmatpush.msrb.mxu1 %v1140_v20 }
  0x67   : > { %811 = vmatmul.msk.f32.vlgmr.msrb.gmra.mxu1 %vm254_vm1, %v941_v10 }
  0xc6   : > { %v300_v11 = vpop.f32.mrf.mxu0 }
  0xcf   : > { %v409_v12 = vpop.f32.mrf.mxu1 }
  0xd0   : > { %v410_v30 = vadd.f32 %v409_v12, %v300_v11 }
  0xd1   : > { %v467_v18 = vpop.f32.mrf.mxu2 }
  0xd2   : > { %v308_v28 = vpop.f32.mrf.mxu0  ;;  %v468_v42 = vadd.f32 %v467_v18, %v410_v30 }
  0xd3   : > { %v511_v22 = vpop.f32.mrf.mxu3 }
  0xd4   : > { %v512_v58 = vadd.f32 %v511_v22, %v468_v42 }
  0xd9   : > { %v413_v34 = vpop.f32.mrf.mxu1 }
  0xda   : > { %v472_v36 = vpop.f32.mrf.mxu2  ;;  %v414_v41 = vadd.f32 %v413_v34, %v308_v28 }
  0xdc   : > { %v473_v49 = vadd.f32 %v472_v36, %v414_v41  ;;  %v586_v53 = vpop.f32.mrf.mxu0 }
  0xdd   : > { %v517_v47 = vpop.f32.mrf.mxu3  ;;  %v587_v59 = vadd.f32 %v586_v53, %v512_v58 }
  0xde   : > { %v518_v61 = vadd.f32 %v517_v47, %v473_v49 }
  0xe4   : > { %v590_v2 = vpop.f32.mrf.mxu2  ;;  %v627_v9 = vpop.f32.mrf.mxu1 }
  0xe5   : > { %v591_v13 = vadd.f32 %v590_v2, %v518_v61  ;;  %v628_v14 = vadd.f32 %v627_v9, %v587_v59 }
  0xe6   : > { %v631_v16 = vpop.f32.mrf.mxu3 }
  0xe7   : > { %v634_v17 = vadd.f32 %v628_v14, %v260_v8  ;;  %v632_v19 = vadd.f32 %v631_v16, %v591_v13  ;;  %642 = sbr.rel (%p813_p9) target bundleno = 502 (0x1f6), region = 40 }
  0xe9   : > { %637 = vst.msk [vmem:[#allocation2] sm:$0xff] %vm636_vm3, %v634_v17  ;;  %v635_v20 = vadd.f32 %v632_v19, %v261_v15 }
  0xeb   : > { %638 = vst.msk [vmem:[#allocation2 + $0x8] sm:$0xff] %vm636_vm3, %v635_v20 }
  0xec   : > { %v942_v27 = vmov 12   ;;  %v687_v3 = vld [vmem:[%s1004_s24] sm:$0xff]  ;;  %vm697_vm12 = vcmask 31744   ;;  %vm700_vm13 = vcmask 130048   ;;  %v688_v24 = vld [vmem:[%s1004_s24 + $0x8] sm:$0xff] }
  0xed   : > { %894 = vset.pattern.permute.xlu0 %v942_v27 }
  0xf0   : > { %v643_v21 = vld [vmem:[#allocation2] sm:$0xff] }
  0xf1   : > { %v645_v29 = vmax.f32 %v643_v21, 1.0 }
  0xf2   : > { %v644_v26 = vld [vmem:[#allocation2 + $0x8] sm:$0xff] }
  0xf3   : > { %v646_v31 = vmax.f32 %v644_v26, 1.0  ;;  %895 = vrcp.f32 %v645_v29  ;;  %v658_v37 = vand.u32 2147483648, %v645_v29  ;;  %vm652_vm4 = vweird.f32 %v645_v29 }
  0xf4   : > { %v656_v40 = vand.u32 2147483647, %v645_v29 }
  0xf5   : > { %897 = vrcp.f32 %v646_v31  ;;  %v659_v45 = vor.u32 1.1754944e-38, %v658_v37  ;;  %vm666_vm8 = vweird.f32 %v646_v31  ;;  %v672_v50 = vand.u32 2147483648, %v646_v31 }
  0xf6   : > { %vm657_vm7 = vcmp.eq.f32.partialorder %v656_v40, 8.507059e+37  ;;  %v670_v54 = vand.u32 2147483647, %v646_v31 }
  0xf7   : > { %v673_v56 = vor.u32 1.1754944e-38, %v672_v50 }
  0xf8   : > { %vm671_vm11 = vcmp.eq.f32.partialorder %v670_v54, 8.507059e+37 }
  0xf9   : > { %v896_v32 = vpop.eup %895 }
  0xfa   : > { %v648_v35 = vmul.f32 %v896_v32, %v645_v29  ;;  %vm653_vm5 = vweird.f32 %v896_v32 }
  0xfb   : > { %v898_v33 = vpop.eup %897  ;;  %vm654_vm6 = vmor %vm652_vm4, %vm653_vm5 }
  0xfc   : > { %v662_v38 = vmul.f32 %v898_v33, %v646_v31  ;;  %v649_v39 = vsub.f32 1.0, %v648_v35  ;;  %vm667_vm9 = vweird.f32 %v898_v33 }
  0xfd   : > { %vm668_vm10 = vmor %vm666_vm8, %vm667_vm9 }
  0xfe   : > { %v663_v43 = vsub.f32 1.0, %v662_v38  ;;  %v650_v44 = vmul.f32 %v896_v32, %v649_v39 }
 0x100   : > { %v664_v46 = vmul.f32 %v898_v33, %v663_v43  ;;  %v651_v48 = vadd.f32 %v896_v32, %v650_v44 }
 0x102   : > { %v655_v51 = vsel %vm654_vm6, %v896_v32, %v651_v48  ;;  %v665_v52 = vadd.f32 %v898_v33, %v664_v46 }
 0x103   : > { %v660_v55 = vsel %vm657_vm7, %v659_v45, %v655_v51 }
 0x104   : > { %677 = vperm.xlu0 %894, %v660_v55   ;;  %v669_v57 = vsel %vm668_vm10, %v898_v33, %v665_v52 }
 0x105   : > { %v674_v60 = vsel %vm671_vm11, %v673_v56, %v669_v57 }
 0x10c   : > { %682 = vperm.xlu0 %894, %v674_v60  }
 0x176   : > { %v678_v62 = vpop.permute.xlu0 %677 }
 0x177   : > { %v685_v63 = vmul.f32 %v678_v62, %v643_v21 }
 0x179   : > { %691 = vrot.lane.b32.xlu1 %v685_v63, %s943_s12 }
 0x17e   : > { %v683_v0 = vpop.permute.xlu0 %682 }
 0x17f   : > { %v686_v1 = vmul.f32 %v683_v0, %v644_v26 }
 0x181   : > { %693 = vrot.lane.b32.xlu1 %v686_v1, %s943_s12 }
 0x1eb   : > { %v692_v23 = vpop.permute.xlu1 %691 }
 0x1ec   : > { %v698_v7 = vsel %vm697_vm12, %v687_v3, %v692_v23 }
 0x1ed   : > { %701 = vst.msk [vmem:[%s1014_s4] sm:$0xff] %vm700_vm13, %v698_v7 }
 0x1f3   : > { %v694_v25 = vpop.permute.xlu1 %693 }
 0x1f4   : > { %v699_v4 = vsel %vm697_vm12, %v688_v24, %v694_v25 }
 0x1f5   : > { %702 = vst.msk [vmem:[%s1014_s4 + $0x8] sm:$0xff] %vm700_vm13, %v699_v4 }
 0x1f6 PF: > { %s13_s16 = sadd.s32 1, %s937_s16   ;;  %s1301_s12 = smov %s929_s14 }
 0x1f7   : > { %p10_p10 = scmp.ge.s32.totalorder %s13_s16, 11   ;;  %s1302_s13 = smov %s933_s15 }
 0x1f8   : > { %s1303_s14 = smov %s1306_s17  ;;  %s1304_s15 = smov %s1310_s18 }
 0x1f9   :  { %12 = sbr.rel (!%p10_p10) target bundleno = 3 (0x3), region = 76 }

</bundles_post_ra>
